<compile_context>
chip_gen: v7x
topology: tpu7x:2x2x1
jax: 0.10.0
libtpu: 0.0.40
codegen_flags: <defaults>
</compile_context>

<pallas_src>
import functools

import jax
import jax.numpy as jnp
from jax.experimental import pallas as pl
from jax.experimental.pallas import tpu as pltpu


def _pixelwise_concat_kernel(cond_ref, img_ref, out_ref, rep_ref, *,
                             c1, bb, hw_mod, w_mod, thw_mod, cache_rep):
    # cond_ref : SMEM, flat (b*c1,)             -- cheap scalar reads
    # img_ref  : VMEM block (BB, c2, TH, w)
    # out_ref  : VMEM block (BB, c1+c2, TH, w)
    # rep_ref  : VMEM scratch (BB, c1, TH, w)   -- broadcast-cond slab (maybe cached)
    bblk = pl.program_id(0)
    ti = pl.program_id(1)
    _, _, th, w = img_ref.shape

    def compute_rep():
        # Phase (mod c1) of the first element of this row tile within the
        # flattened repeat(1, h*w).view(...) index stream.  All intermediates
        # are tiny, so int32 cannot overflow.
        phase = ((ti % c1) * thw_mod) % c1
        r = jax.lax.broadcasted_iota(jnp.int32, (th, w), 0)
        x = jax.lax.broadcasted_iota(jnp.int32, (th, w), 1)
        base = (r * w_mod + x + phase) % c1            # in [0, c1); one modulo total
        for i in range(bb):                            # static unroll (BB is small)
            gb = bblk * bb + i                         # global batch index
            # Hoisted SMEM scalar reads (one list per batch, reused below).
            scal = [cond_ref[gb * c1 + k].astype(out_ref.dtype) for k in range(c1)]
            for j in range(c1):                        # channel of the rep slab
                cj = (j * hw_mod) % c1                 # static per-channel offset
                rep = jnp.zeros((th, w), dtype=out_ref.dtype)
                for m in range(c1):                    # one-hot select, small c1
                    rep = jnp.where(base == m, scal[(cj + m) % c1], rep)
                rep_ref[i, j] = rep

    if cache_rep:
        # Tile phase is invariant: compute once per batch block, reuse across the
        # (sequential, "arbitrary") row-tile axis.
        pl.when(ti == 0)(compute_rep)
    else:
        compute_rep()

    # Two direct, tile-aligned stores (channel slicing is on a leading dim of the
    # (TH, w)-tiled block) -- no concatenate temporary.
    out_ref[:, c1:, :, :] = img_ref[...].astype(out_ref.dtype)
    out_ref[:, :c1, :, :] = rep_ref[...]


def _choose_tiling(b, c1, c2, h, w, itemsize, block_budget):
    """Pick (batch_block, tile_rows).

    TH is the largest divisor of h that is a multiple of 8 (or h itself) whose
    double-buffered image+output blocks plus the rep scratch fit block_budget.
    The batch block is then grown over divisors of b (keeping >= 2 batch blocks
    when b >= 2 so the v7x megacore can split the batch axis) until each grid
    step moves ~>=4 MiB of HBM traffic.
    """
    c_out = c1 + c2
    row_vmem = (2 * (c2 + c_out) + c1) * w * itemsize      # per h-row, per batch
    row_traffic = (c2 + c_out) * w * itemsize
    cands = sorted({d for d in range(8, h + 1, 8) if h % d == 0} | {h})
    fitting = [d for d in cands if d * row_vmem <= block_budget]
    th = fitting[-1] if fitting else cands[0]

    target = 4 << 20
    bb = 1
    max_bb = b if b == 1 else max(1, b // 2)
    for cand in range(1, max_bb + 1):
        if b % cand:
            continue
        if cand * th * row_vmem > block_budget:
            break
        bb = cand
        if cand * th * row_traffic >= target:
            break
    return bb, th


def pixelwise_concat(image, cond, *, tile_rows=None, batch_block=None):
    """image: (b, c2, h, w), cond: (b, c1) -> (b, c1+c2, h, w)."""
    b, c2, h, w = image.shape
    bc, c1 = cond.shape
    assert bc == b, "batch mismatch between image and cond"
    c_out = c1 + c2
    out_dtype = image.dtype
    isz = jnp.dtype(out_dtype).itemsize

    # Generation-aware VMEM budget (v7x: 64 MiB/TC, v5e/v6e: 128 MiB).
    try:
        vmem_cap = int(getattr(pltpu.get_tpu_info(), "vmem_capacity_bytes", 64 << 20))
    except Exception:  # conservative fallback if the query is unavailable
        vmem_cap = 64 << 20
    block_budget = min(vmem_cap // 3, 40 << 20)

    bb_auto, th_auto = _choose_tiling(b, c1, c2, h, w, isz, block_budget)
    th = th_auto if tile_rows is None else tile_rows
    bb = bb_auto if batch_block is None else batch_block
    assert h % th == 0 and (th % 8 == 0 or th == h), "invalid row tile"
    assert b % bb == 0, "invalid batch block"
    nb, nt = b // bb, h // th

    thw_mod = (th * w) % c1
    cache_rep = (nt == 1) or (thw_mod == 0)

    block_bytes = bb * th * w * isz * (2 * (c2 + c_out) + c1)
    vmem_limit = int(min(max(2 * block_bytes, 32 << 20), (3 * vmem_cap) // 4))
    vmem_limit = max(vmem_limit, min(block_bytes + (4 << 20), vmem_cap))

    cost = pl.CostEstimate(
        flops=0,
        transcendentals=0,
        bytes_accessed=int(image.size * image.dtype.itemsize
                           + cond.size * cond.dtype.itemsize
                           + b * c_out * h * w * isz),
    )

    kernel = functools.partial(
        _pixelwise_concat_kernel,
        c1=c1, bb=bb,
        hw_mod=(h * w) % c1,
        w_mod=w % c1,
        thw_mod=thw_mod,
        cache_rep=cache_rep,
    )

    # Row-tile axis must stay sequential ("arbitrary") when the rep slab is
    # cached across tiles; otherwise both axes are megacore-parallel.
    dim_sem = ("parallel", "arbitrary" if (cache_rep and nt > 1) else "parallel")

    return pl.pallas_call(
        kernel,
        out_shape=jax.ShapeDtypeStruct((b, c_out, h, w), out_dtype),
        grid=(nb, nt),
        in_specs=[
            pl.BlockSpec(memory_space=pltpu.MemorySpace.SMEM),          # flat cond
            pl.BlockSpec((bb, c2, th, w), lambda bi, ti: (bi, 0, ti, 0)),
        ],
        out_specs=pl.BlockSpec((bb, c_out, th, w), lambda bi, ti: (bi, 0, ti, 0)),
        scratch_shapes=[pltpu.VMEM((bb, c1, th, w), out_dtype)],
        compiler_params=pltpu.CompilerParams(
            dimension_semantics=dim_sem,
            vmem_limit_bytes=vmem_limit,
        ),
        cost_estimate=cost,
    )(cond.reshape(b * c1), image)


def _reference(image, cond):
    b, c2, h, w = image.shape
    _, c1 = cond.shape
    rep = jnp.tile(cond, (1, h * w)).reshape(b, c1, h, w)
    return jnp.concatenate([rep, image], axis=1)


if __name__ == "__main__":
    def run_case(tag, b, c1, c2, h, w, **kw):
        key = jax.random.fold_in(jax.random.PRNGKey(0), tag)
        k1, k2 = jax.random.split(key)
        image = jax.random.normal(k1, (b, c2, h, w), dtype=jnp.float32)
        cond = jax.random.normal(k2, (b, c1), dtype=jnp.float32)
        out = pixelwise_concat(image, cond, **kw)
        jax.block_until_ready(out)
        ref = _reference(image, cond)
        assert out.shape == (b, c1 + c2, h, w)
        assert jnp.allclose(out, ref), f"mismatch vs reference (case {tag})"

    # Primary small case from the module spec (single row tile per batch).
    run_case(0, b=2, c1=3, c2=4, h=16, w=16)
    # Multi-tile path with per-step rep recomputation (tile phase varies, c1=3).
    run_case(1, b=2, c1=3, c2=4, h=32, w=16, tile_rows=8)
    # Multi-tile path exercising the cached rep slab ((TH*w) % c1 == 0).
    run_case(2, b=2, c1=2, c2=4, h=32, w=16, tile_rows=8)
    print("KERNEL_OK")
</pallas_src>

<mosaic_0001>
module attributes {stable_mosaic.version = 11 : i64} {
  func.func @_pixelwise_concat_kernel(%arg0: i32, %arg1: i32, %arg2: memref<6xf32, #tpu.memory_space<smem>>, %arg3: memref<1x4x16x16xf32, #tpu.memory_space<vmem>>, %arg4: memref<1x7x16x16xf32, #tpu.memory_space<vmem>>, %arg5: memref<1x3x16x16xf32, #tpu.memory_space<vmem>>) attributes {dimension_semantics = [#tpu.dimension_semantics<parallel>, #tpu.dimension_semantics<parallel>], iteration_bounds = array<i64: 2, 1>, scalar_prefetch = 0 : i64, scratch_operands = 1 : i64, tpu.core_type = #tpu.core_type<tc>, window_params = [{transform_indices = @transform_0, window_bounds = array<i64: 6>}, {transform_indices = @transform_1, window_bounds = array<i64: 1, 4, 16, 16>}, {transform_indices = @transform_2, window_bounds = array<i64: 1, 7, 16, 16>}]} {
    %c0_i32 = arith.constant 0 : i32
    %0 = arith.cmpi eq, %arg1, %c0_i32 : i32
    %1 = arith.extui %0 : i1 to i32
    %c0_i32_0 = arith.constant 0 : i32
    %2 = arith.cmpi ne, %1, %c0_i32_0 : i32
    scf.if %2 {
      %c3_i32 = arith.constant 3 : i32
      %c0_i32_15 = arith.constant 0 : i32
      %7 = arith.cmpi eq, %c3_i32, %c0_i32_15 : i32
      %c1_i32 = arith.constant 1 : i32
      %8 = arith.select %7, %c1_i32, %c3_i32 : i32
      %9 = arith.remsi %arg1, %8 : i32
      %c0_i32_16 = arith.constant 0 : i32
      %10 = arith.cmpi ne, %9, %c0_i32_16 : i32
      %c0_i32_17 = arith.constant 0 : i32
      %11 = arith.cmpi slt, %9, %c0_i32_17 : i32
      %c0_i32_18 = arith.constant 0 : i32
      %12 = arith.cmpi slt, %8, %c0_i32_18 : i32
      %13 = arith.xori %11, %12 : i1
      %14 = arith.andi %13, %10 : i1
      %15 = arith.addi %9, %8 : i32
      %16 = arith.select %14, %15, %9 : i32
      %c1_i32_19 = arith.constant 1 : i32
      %17 = arith.muli %16, %c1_i32_19 : i32
      %c3_i32_20 = arith.constant 3 : i32
      %c0_i32_21 = arith.constant 0 : i32
      %18 = arith.cmpi eq, %c3_i32_20, %c0_i32_21 : i32
      %c1_i32_22 = arith.constant 1 : i32
      %19 = arith.select %18, %c1_i32_22, %c3_i32_20 : i32
      %20 = arith.remsi %17, %19 : i32
      %c0_i32_23 = arith.constant 0 : i32
      %21 = arith.cmpi ne, %20, %c0_i32_23 : i32
      %c0_i32_24 = arith.constant 0 : i32
      %22 = arith.cmpi slt, %20, %c0_i32_24 : i32
      %c0_i32_25 = arith.constant 0 : i32
      %23 = arith.cmpi slt, %19, %c0_i32_25 : i32
      %24 = arith.xori %22, %23 : i1
      %25 = arith.andi %24, %21 : i1
      %26 = arith.addi %20, %19 : i32
      %27 = arith.select %25, %26, %20 : i32
      %28 = tpu.iota {dimensions = array<i32: 0>} : vector<16x16xi32>
      %29 = tpu.iota {dimensions = array<i32: 1>} : vector<16x16xi32>
      %c1_i32_26 = arith.constant 1 : i32
      %30 = vector.broadcast %c1_i32_26 : i32 to vector<16x16xi32>
      %31 = arith.muli %28, %30 : vector<16x16xi32>
      %32 = arith.addi %31, %29 : vector<16x16xi32>
      %33 = vector.broadcast %27 : i32 to vector<16x16xi32>
      %34 = arith.addi %32, %33 : vector<16x16xi32>
      %c3_i32_27 = arith.constant 3 : i32
      %c0_i32_28 = arith.constant 0 : i32
      %35 = arith.cmpi eq, %c3_i32_27, %c0_i32_28 : i32
      %c1_i32_29 = arith.constant 1 : i32
      %36 = arith.select %35, %c1_i32_29, %c3_i32_27 : i32
      %37 = vector.broadcast %36 : i32 to vector<16x16xi32>
      %38 = arith.remsi %34, %37 : vector<16x16xi32>
      %c0_i32_30 = arith.constant 0 : i32
      %39 = vector.broadcast %c0_i32_30 : i32 to vector<16x16xi32>
      %40 = arith.cmpi ne, %38, %39 : vector<16x16xi32>
      %c0_i32_31 = arith.constant 0 : i32
      %41 = vector.broadcast %c0_i32_31 : i32 to vector<16x16xi32>
      %42 = arith.cmpi slt, %38, %41 : vector<16x16xi32>
      %c0_i32_32 = arith.constant 0 : i32
      %43 = arith.cmpi slt, %36, %c0_i32_32 : i32
      %44 = vector.broadcast %43 : i1 to vector<16x16xi1>
      %45 = vector.broadcast %44 : vector<16x16xi1> to vector<16x16xi1>
      %46 = arith.xori %42, %45 : vector<16x16xi1>
      %47 = arith.andi %46, %40 : vector<16x16xi1>
      %48 = vector.broadcast %36 : i32 to vector<16x16xi32>
      %49 = arith.addi %38, %48 : vector<16x16xi32>
      %50 = arith.select %47, %49, %38 : vector<16x16xi1>, vector<16x16xi32>
      %c1_i32_33 = arith.constant 1 : i32
      %51 = arith.muli %arg0, %c1_i32_33 : i32
      %c0_i32_34 = arith.constant 0 : i32
      %52 = arith.addi %51, %c0_i32_34 : i32
      %c3_i32_35 = arith.constant 3 : i32
      %53 = arith.muli %52, %c3_i32_35 : i32
      %c0_i32_36 = arith.constant 0 : i32
      %54 = arith.addi %53, %c0_i32_36 : i32
      %55 = arith.index_cast %54 : i32 to index
      %56 = memref.load %arg2[%55] : memref<6xf32, #tpu.memory_space<smem>>
      %c3_i32_37 = arith.constant 3 : i32
      %57 = arith.muli %52, %c3_i32_37 : i32
      %c1_i32_38 = arith.constant 1 : i32
      %58 = arith.addi %57, %c1_i32_38 : i32
      %59 = arith.index_cast %58 : i32 to index
      %60 = memref.load %arg2[%59] : memref<6xf32, #tpu.memory_space<smem>>
      %c3_i32_39 = arith.constant 3 : i32
      %61 = arith.muli %52, %c3_i32_39 : i32
      %c2_i32 = arith.constant 2 : i32
      %62 = arith.addi %61, %c2_i32 : i32
      %63 = arith.index_cast %62 : i32 to index
      %64 = memref.load %arg2[%63] : memref<6xf32, #tpu.memory_space<smem>>
      %cst = arith.constant 0.000000e+00 : f32
      %65 = vector.broadcast %cst : f32 to vector<16x16xf32>
      %c0_i32_40 = arith.constant 0 : i32
      %66 = vector.broadcast %c0_i32_40 : i32 to vector<16x16xi32>
      %67 = arith.cmpi eq, %50, %66 : vector<16x16xi32>
      %68 = vector.broadcast %56 : f32 to vector<16x16xf32>
      %69 = arith.select %67, %68, %65 : vector<16x16xi1>, vector<16x16xf32>
      %c1_i32_41 = arith.constant 1 : i32
      %70 = vector.broadcast %c1_i32_41 : i32 to vector<16x16xi32>
      %71 = arith.cmpi eq, %50, %70 : vector<16x16xi32>
      %72 = vector.broadcast %60 : f32 to vector<16x16xf32>
      %73 = arith.select %71, %72, %69 : vector<16x16xi1>, vector<16x16xf32>
      %c2_i32_42 = arith.constant 2 : i32
      %74 = vector.broadcast %c2_i32_42 : i32 to vector<16x16xi32>
      %75 = arith.cmpi eq, %50, %74 : vector<16x16xi32>
      %76 = vector.broadcast %64 : f32 to vector<16x16xf32>
      %77 = arith.select %75, %76, %73 : vector<16x16xi1>, vector<16x16xf32>
      %c0_43 = arith.constant 0 : index
      %c0_44 = arith.constant 0 : index
      %c0_45 = arith.constant 0 : index
      %c0_46 = arith.constant 0 : index
      %78 = vector.load %arg5[%c0_43, %c0_44, %c0_45, %c0_46] : memref<1x3x16x16xf32, #tpu.memory_space<vmem>>, vector<1x1x16x16xf32>
      %79 = vector.shape_cast %78 : vector<1x1x16x16xf32> to vector<16x16xf32>
      %80 = vector.shape_cast %77 : vector<16x16xf32> to vector<1x1x16x16xf32>
      tpu.vector_store %arg5[%c0_43, %c0_44, %c0_45, %c0_46], %80 {strides = array<i32>} : memref<1x3x16x16xf32, #tpu.memory_space<vmem>>, vector<1x1x16x16xf32>,
      %cst_47 = arith.constant 0.000000e+00 : f32
      %81 = vector.broadcast %cst_47 : f32 to vector<16x16xf32>
      %c0_i32_48 = arith.constant 0 : i32
      %82 = vector.broadcast %c0_i32_48 : i32 to vector<16x16xi32>
      %83 = arith.cmpi eq, %50, %82 : vector<16x16xi32>
      %84 = vector.broadcast %60 : f32 to vector<16x16xf32>
      %85 = arith.select %83, %84, %81 : vector<16x16xi1>, vector<16x16xf32>
      %c1_i32_49 = arith.constant 1 : i32
      %86 = vector.broadcast %c1_i32_49 : i32 to vector<16x16xi32>
      %87 = arith.cmpi eq, %50, %86 : vector<16x16xi32>
      %88 = vector.broadcast %64 : f32 to vector<16x16xf32>
      %89 = arith.select %87, %88, %85 : vector<16x16xi1>, vector<16x16xf32>
      %c2_i32_50 = arith.constant 2 : i32
      %90 = vector.broadcast %c2_i32_50 : i32 to vector<16x16xi32>
      %91 = arith.cmpi eq, %50, %90 : vector<16x16xi32>
      %92 = vector.broadcast %56 : f32 to vector<16x16xf32>
      %93 = arith.select %91, %92, %89 : vector<16x16xi1>, vector<16x16xf32>
      %c0_51 = arith.constant 0 : index
      %c1 = arith.constant 1 : index
      %c0_52 = arith.constant 0 : index
      %c0_53 = arith.constant 0 : index
      %94 = vector.load %arg5[%c0_51, %c1, %c0_52, %c0_53] : memref<1x3x16x16xf32, #tpu.memory_space<vmem>>, vector<1x1x16x16xf32>
      %95 = vector.shape_cast %94 : vector<1x1x16x16xf32> to vector<16x16xf32>
      %96 = vector.shape_cast %93 : vector<16x16xf32> to vector<1x1x16x16xf32>
      tpu.vector_store %arg5[%c0_51, %c1, %c0_52, %c0_53], %96 {strides = array<i32>} : memref<1x3x16x16xf32, #tpu.memory_space<vmem>>, vector<1x1x16x16xf32>,
      %cst_54 = arith.constant 0.000000e+00 : f32
      %97 = vector.broadcast %cst_54 : f32 to vector<16x16xf32>
      %c0_i32_55 = arith.constant 0 : i32
      %98 = vector.broadcast %c0_i32_55 : i32 to vector<16x16xi32>
      %99 = arith.cmpi eq, %50, %98 : vector<16x16xi32>
      %100 = vector.broadcast %64 : f32 to vector<16x16xf32>
      %101 = arith.select %99, %100, %97 : vector<16x16xi1>, vector<16x16xf32>
      %c1_i32_56 = arith.constant 1 : i32
      %102 = vector.broadcast %c1_i32_56 : i32 to vector<16x16xi32>
      %103 = arith.cmpi eq, %50, %102 : vector<16x16xi32>
      %104 = vector.broadcast %56 : f32 to vector<16x16xf32>
      %105 = arith.select %103, %104, %101 : vector<16x16xi1>, vector<16x16xf32>
      %c2_i32_57 = arith.constant 2 : i32
      %106 = vector.broadcast %c2_i32_57 : i32 to vector<16x16xi32>
      %107 = arith.cmpi eq, %50, %106 : vector<16x16xi32>
      %108 = vector.broadcast %60 : f32 to vector<16x16xf32>
      %109 = arith.select %107, %108, %105 : vector<16x16xi1>, vector<16x16xf32>
      %c0_58 = arith.constant 0 : index
      %c2 = arith.constant 2 : index
      %c0_59 = arith.constant 0 : index
      %c0_60 = arith.constant 0 : index
      %110 = vector.load %arg5[%c0_58, %c2, %c0_59, %c0_60] : memref<1x3x16x16xf32, #tpu.memory_space<vmem>>, vector<1x1x16x16xf32>
      %111 = vector.shape_cast %110 : vector<1x1x16x16xf32> to vector<16x16xf32>
      %112 = vector.shape_cast %109 : vector<16x16xf32> to vector<1x1x16x16xf32>
      tpu.vector_store %arg5[%c0_58, %c2, %c0_59, %c0_60], %112 {strides = array<i32>} : memref<1x3x16x16xf32, #tpu.memory_space<vmem>>, vector<1x1x16x16xf32>,
    } else {
    }
    %c0 = arith.constant 0 : index
    %c0_1 = arith.constant 0 : index
    %c0_2 = arith.constant 0 : index
    %c0_3 = arith.constant 0 : index
    %3 = vector.load %arg3[%c0, %c0_1, %c0_2, %c0_3] : memref<1x4x16x16xf32, #tpu.memory_space<vmem>>, vector<1x4x16x16xf32>
    %c0_4 = arith.constant 0 : index
    %c3 = arith.constant 3 : index
    %c0_5 = arith.constant 0 : index
    %c0_6 = arith.constant 0 : index
    %4 = vector.load %arg4[%c0_4, %c3, %c0_5, %c0_6] : memref<1x7x16x16xf32, #tpu.memory_space<vmem>>, vector<1x4x16x16xf32>
    tpu.vector_store %arg4[%c0_4, %c3, %c0_5, %c0_6], %3 {strides = array<i32>} : memref<1x7x16x16xf32, #tpu.memory_space<vmem>>, vector<1x4x16x16xf32>,
    %c0_7 = arith.constant 0 : index
    %c0_8 = arith.constant 0 : index
    %c0_9 = arith.constant 0 : index
    %c0_10 = arith.constant 0 : index
    %5 = vector.load %arg5[%c0_7, %c0_8, %c0_9, %c0_10] : memref<1x3x16x16xf32, #tpu.memory_space<vmem>>, vector<1x3x16x16xf32>
    %c0_11 = arith.constant 0 : index
    %c0_12 = arith.constant 0 : index
    %c0_13 = arith.constant 0 : index
    %c0_14 = arith.constant 0 : index
    %6 = vector.load %arg4[%c0_11, %c0_12, %c0_13, %c0_14] : memref<1x7x16x16xf32, #tpu.memory_space<vmem>>, vector<1x3x16x16xf32>
    tpu.vector_store %arg4[%c0_11, %c0_12, %c0_13, %c0_14], %5 {strides = array<i32>} : memref<1x7x16x16xf32, #tpu.memory_space<vmem>>, vector<1x3x16x16xf32>,
    return
  }
  func.func @transform_0(%arg0: i32, %arg1: i32) -> i32 {
    %c0_i32 = arith.constant 0 : i32
    %c0_i32_0 = arith.constant 0 : i32
    return %c0_i32 : i32
  }
  func.func @transform_1(%arg0: i32, %arg1: i32) -> (i32, i32, i32, i32) {
    %c0_i32 = arith.constant 0 : i32
    %c0_i32_0 = arith.constant 0 : i32
    %c0_i32_1 = arith.constant 0 : i32
    return %arg0, %c0_i32, %arg1, %c0_i32_0 : i32, i32, i32, i32
  }
  func.func @transform_2(%arg0: i32, %arg1: i32) -> (i32, i32, i32, i32) {
    %c0_i32 = arith.constant 0 : i32
    %c0_i32_0 = arith.constant 0 : i32
    %c0_i32_1 = arith.constant 0 : i32
    return %arg0, %c0_i32, %arg1, %c0_i32_0 : i32, i32, i32, i32
  }
}

</mosaic_0001>

<bundles_post_ra>
// kernel: tpu_custom_call.1
= control target key start
LH: loop header
LB: loop body
LE: loop exit
PB: predicated region body
PF: predicated region fallthrough
CT: control target
= control target key end

     0   :  { %7 = vsyncpa [#allocation6], 0  ;;  %s975_s0 = inlined_call_operand.hbm [shape: f32[6], index: 0, kind: input, shape index: {}]   ;;  %s976_s1 = inlined_call_operand.hbm [shape: f32[2,4,16,16], index: 1, kind: input, shape index: {}]   ;;  %s977_s2 = inlined_call_operand.hbm [shape: f32[2,7,16,16], index: 2, kind: output, shape index: {}]  }
   0x1   :  { %8 = vsyncpa [#allocation4], 0 }
   0x2   :  { %10 = vsyncpa [#allocation4 + $0x1], 0 }
   0x3   :  { %11 = vsyncpa [#allocation5], 0 }
   0x4   :  { %13 = vsyncpa [#allocation5 + $0x1], 0  ;;  %s712_s9 = smov 0   ;;  %s714_s10 = smov 0  }
   0x5   :  { %s716_s11 = smov 0   ;;  %s718_s12 = smov 0  }
   0x6   :  { %s720_s13 = smov 0   ;;  %s722_s14 = smov 0  }
   0x7 LB: > { %s453_s15 = sadd.s32 4294967295, %s688_s14   ;;  %s454_s16 = sadd.s32 4294967294, %s688_s14   ;;  %s688_s14 = sphi %s722_s14, %s19_s14   ;;  %s684_s13 = sphi %s720_s13, %s997_s13   ;;  %s680_s12 = sphi %s718_s12, %s996_s12   ;;  %s676_s11 = sphi %s716_s11, %s995_s11   ;;  %s672_s10 = sphi %s714_s10, %s994_s10   ;;  %s668_s9 = sphi %s712_s9, %s993_s9  }
   0x8   : > { %s61_s17 = sadd.s32 1, %s676_s11  ;;  %p68_p0 = scmp.ne.s32.totalorder %s676_s11, %s672_s10 }
   0x9   : > { %p69_p1 = scmp.eq.s32.totalorder %s688_s14, 0  ;;  %p74_p2 = scmp.ne.s32.totalorder %s672_s10, %s668_s9 }
   0xa   : > { %p750_p3 = scmp.eq.s32.totalorder %s453_s15, 0  ;;  %p100_p4 = scmp.eq.s32.totalorder %s453_s15, 1 }
   0xb   : > { %p70_p5 = por %p69_p1, %p68_p0  ;;  %p106_p6 = scmp.eq.s32.totalorder %s454_s16, 1 }
   0xc   : > { %s982_s18 = scalar_select %p750_p3, 1, 0 }
   0xd   : > { %p756_p7 = por %p750_p3, %p74_p2  ;;  %p760_p8 = por %p100_p4, %p68_p0 }
   0xe   : > { %p764_p9 = por %p106_p6, %p74_p2  ;;  %p455_p10 = scmp.ge.s32.totalorder %s688_s14, 1 }
   0xf   : > { %s983_s19 = scalar_select %p756_p7, 1, 0 }
  0x10   : > { %s984_s20 = scalar_select %p760_p8, 1, 0 }
  0x11   : > { %s985_s21 = scalar_select %p764_p9, 1, 0 }
  0x12   : > { %p113_p11 = scmp.lt.s32.totalorder %s688_s14, 3  ;;  %p503_p1 = scmp.lt.s32.totalorder %s688_s14, 2 }
  0x13   : > { %s135_s23 = sand.u32 1, %s676_s11   ;;  %s31_s25 = sadd.s32 1, %s684_s13 }
  0x14   : > { %p771_p13 = pnand %p455_p10, %p113_p11  ;;  %p779_p0 = pnand %p503_p1, %p70_p5 }
  0x15   : > { %s458_s26 = sshll.u32 %s135_s23, 6  ;;  %p33_p4 = scmp.ge.s32.totalorder %s31_s25, 2 }
  0x16   : > { %p490_p7 = pneg %p771_p13  ;;  %s559_s29 = scalar_lea.hbm %s975_s0, 16 }
  0x17   : > { %p560_p6 = scmp.ne.s32.totalorder %s975_s0, %s559_s29  ;;  %p566_p5 = scmp.lt.u32.totalorder %s559_s29, %s975_s0 }
  0x18   : > { %p491_p2 = pnand %p490_p7, %p750_p3 }
  0x1a   : > { %p561_p10 = pneg %p491_p2 }
  0x1c   : > { %p562_p11 = pnand %p561_p10, %p560_p6 }
  0x1e   : > { %p563_p12 = pneg %p562_p11 }
  0x20   : > { %p568_p1 = pnand %p566_p5, %p563_p12 }
  0x22   : > { %571 = shalt.err (!%p568_p1)
}
  0x23   : > { %s690_s6 = smov [#allocation3]   ;;  %s999_s25 = smov (%p33_p4, %s31_s25), 0 }
  0x24   : > { %493 = dma.hbm_to_smem (!%p491_p2), %s975_s0, 16, %s690_s6, [#allocation6]  }
  0x25   : > { %s475_s15 = sshll.u32 %s684_s13, 10  ;;  %s56_s16 = ssub.s32 %s684_s13, %s999_s25 }
  0x26   : > { %s806_s29 = scalar_lea.hbm %s976_s1, %s475_s15  ;;  %p59_p7 = scmp.eq.s32.totalorder %s56_s16, 0 }
  0x27   : > { %s139_s30 = scalar_lea.vmem [#allocation7], %s458_s26  ;;  %s815_s5 = scalar_lea.sflag [#allocation4], %s135_s23 }
  0x28   : > { %s148_s3 = sshll.u32 %s139_s30, 4  ;;  %s572_s6 = scalar_lea.hbm %s806_s29, 1024  ;;  %s808_s3 = int_to_ptr.vmem [resolvable:$true] %s148_s3 }
  0x29   : > { %s813_s4 = scalar_select %p59_p7, %s676_s11, %s61_s17  }
  0x2a   : > { %p573_p12 = scmp.ne.s32.totalorder %s806_s29, %s572_s6  ;;  %p574_p2 = pneg %p779_p0 }
  0x2b   : > { %s577_s26 = scalar_lea.hbm %s976_s1, 2048  ;;  %p578_p10 = scmp.lt.u32.totalorder %s806_s29, %s976_s1 }
  0x2c   : > { %p575_p4 = pnand %p574_p2, %p573_p12  ;;  %p579_p11 = scmp.lt.u32.totalorder %s577_s26, %s572_s6 }
  0x2d   : > { %p581_p1 = scmp.lt.u32.totalorder %s572_s6, %s806_s29 }
  0x2e   : > { %p576_p6 = pneg %p575_p4  ;;  %p580_p5 = por %p579_p11, %p578_p10 }
  0x30   : > { %p582_p7 = por %p581_p1, %p580_p5 }
  0x32   : > { %p583_p9 = pnand %p582_p7, %p576_p6 }
  0x34   : > { %586 = shalt.err (!%p583_p9)
}
  0x35   : > { %s587_s17 = scalar_lea.vmem %s808_s3, 1024  ;;  %s691_s23 = smov [#allocation7]  }
  0x36   : > { %p588_p12 = scmp.ne.s32.totalorder %s808_s3, %s587_s17  ;;  %s592_s27 = sshll.u32 %s691_s23, 4  ;;  %s593_s27 = int_to_ptr.vmem [resolvable:$false] %s592_s27 }
  0x37   : > { %s594_s28 = scalar_lea.vmem %s593_s27, 2048  ;;  %p595_p3 = scmp.lt.s32.totalorder %s808_s3, %s593_s27 }
  0x38   : > { %p590_p4 = pnand %p588_p12, %p574_p2  ;;  %p596_p10 = scmp.lt.s32.totalorder %s594_s28, %s587_s17 }
  0x3a   : > { %p591_p8 = pneg %p590_p4  ;;  %p597_p11 = por %p596_p10, %p595_p3 }
  0x3c   : > { %p598_p5 = pnand %p597_p11, %p591_p8 }
  0x3e   : > { %601 = shalt.err (!%p598_p5)
}
  0x3f   : > { %s692_s30 = smov 128   ;;  %s693_s6 = smov 8  }
  0x40   : > { %497 = dma.hbm_to_vmem [thread:$0]  (!%p779_p0), %s806_s29, 1024, %s808_s3, %s815_s5, %s692_s30, %s692_s30, %s693_s6  }
  0x41   : > { %160 = sbr.rel (%p771_p13) target bundleno = 127 (0x7f), region = 28  ;;  %p988_p9 = scmp.ne.s32.totalorder (!%p771_p13), %s982_s18, 0 }
  0x48   : > { %655 = dma.done.wait (%p988_p9), [#allocation6], 16  }
  0x49   : > { %657 = vsyncadd (%p988_p9), [#allocation6], 4294967280  ;;  %s850_s7 = sand.u32 1, %s672_s10   ;;  %p989_p3 = scmp.ne.s32.totalorder %s983_s19, 0 }
  0x4a   : > { %s463_s8 = sshll.u32 %s850_s7, 6  ;;  %s167_s26 = scalar_lea.sflag [#allocation4], %s850_s7 }
  0x4b   : > { %s170_s15 = scalar_lea.vmem [#allocation7], %s463_s8 }
  0x4c   : > { %659 = dma.done.wait (%p989_p3), %s167_s26, 1024  }
  0x4d   : > { %661 = vsyncadd (%p989_p3), %s167_s26, 4294966272 }
  0x4e   : > { %175 = sfence }
  0x4f   : > { %v224_v0 = vlaneseq  ;;  %v308_v1 = vld [vmem:[%s170_s15] sm:$0xff]  ;;  %v309_v2 = vld [vmem:[%s170_s15 + $0x8] sm:$0xff]  ;;  %s476_s18 = smul.u32 112, %s850_s7  ;;  %v310_v3 = vld [vmem:[%s170_s15 + $0x10] sm:$0xff]  ;;  %vm287_vm0 = vcmask 130048   ;;  %s339_s30 = scalar_lea.sflag [#allocation5], %s850_s7 }
  0x50   : > { %v311_v4 = vld [vmem:[%s170_s15 + $0x18] sm:$0xff]  ;;  %v312_v5 = vld [vmem:[%s170_s15 + $0x20] sm:$0xff]  ;;  %s266_s22 = smul.u32 3, %s680_s12  ;;  %v313_v8 = vld [vmem:[%s170_s15 + $0x28] sm:$0xff]  ;;  %p990_p13 = scmp.ne.s32.totalorder %s984_s20, 0 }
  0x51   : > { %v225_v6 = vshrl.u32 %v224_v0, 7  ;;  %v228_v7 = vand.u32 127, %v224_v0  ;;  %v314_v9 = vld [vmem:[%s170_s15 + $0x30] sm:$0xff]  ;;  %v315_v10 = vld [vmem:[%s170_s15 + $0x38] sm:$0xff]  ;;  %s860_s19 = scalar_lea.vmem [#allocation8], %s476_s18  ;;  %s481_s17 = smul.u32 1792, %s680_s12 }
  0x52   : > { %464 = vst.msk [vmem:[%s860_s19 + $0x30] sm:$0xff] %vm287_vm0, %v308_v1  ;;  %465 = vst.msk [vmem:[%s860_s19 + $0x38] sm:$0xff] %vm287_vm0, %v309_v2  ;;  %s268_s24 = sadd.s32 1, %s266_s22  ;;  %s270_s29 = sadd.s32 2, %s266_s22 }
  0x53   : > { %v229_v11 = vadd.s32 %v228_v7, %v225_v6  ;;  %v226_v12 = vadd.s32 8, %v225_v6  ;;  %466 = vst.msk [vmem:[%s860_s19 + $0x40] sm:$0xff] %vm287_vm0, %v310_v3  ;;  %467 = vst.msk [vmem:[%s860_s19 + $0x48] sm:$0xff] %vm287_vm0, %v311_v4  ;;  %s267_s3 = sld [smem:[#allocation3 + %s266_s22]]  ;;  %s354_s23 = sshll.u32 %s860_s19, 4  ;;  %s913_s23 = int_to_ptr.vmem [resolvable:$true] %s354_s23 }
  0x54   : > { %468 = vst.msk [vmem:[%s860_s19 + $0x50] sm:$0xff] %vm287_vm0, %v312_v5  ;;  %469 = vst.msk [vmem:[%s860_s19 + $0x58] sm:$0xff] %vm287_vm0, %v313_v8  ;;  %s269_s5 = sld [smem:[#allocation3 + %s268_s24]]  ;;  %s924_s28 = scalar_lea.hbm %s977_s2, %s481_s17 }
  0x55   : > { %470 = vst.msk [vmem:[%s860_s19 + $0x60] sm:$0xff] %vm287_vm0, %v314_v9  ;;  %471 = vst.msk [vmem:[%s860_s19 + $0x68] sm:$0xff] %vm287_vm0, %v315_v10  ;;  %v878_v13 = vmul.u32.u64.low 2863311531, %v229_v11  ;;  %v879_v14 = vmul.u32.u64.high 2863311531, %v229_v11, %v878_v13  ;;  %v230_v15 = vadd.s32 %v228_v7, %v226_v12  ;;  %s271_s16 = sld [smem:[#allocation3 + %s270_s29]]  ;;  %s602_s6 = scalar_lea.vmem %s913_s23, 1792 }
  0x56   : > { %p603_p8 = scmp.ne.s32.totalorder %s913_s23, %s602_s6  ;;  %s694_s8 = smov [#allocation8]  }
  0x57   : > { %v881_v16 = vmul.u32.u64.low 2863311531, %v230_v15  ;;  %v882_v17 = vmul.u32.u64.high 2863311531, %v230_v15, %v881_v16  ;;  %v240_v18 = vshrl.u32 %v879_v14, 1  ;;  %s606_s26 = sshll.u32 %s694_s8, 4  ;;  %s607_s26 = int_to_ptr.vmem [resolvable:$false] %s606_s26 }
  0x58   : > { %p604_p0 = pnand %p603_p8, %p990_p13  ;;  %s608_s15 = scalar_lea.vmem %s607_s26, 3584 }
  0x59   : > { %v241_v19 = vmul.u32 3, %v240_v18  ;;  %v251_v20 = vshrl.u32 %v882_v17, 1  ;;  %v274_v25 = vstv %s267_s3  ;;  %p609_p6 = scmp.lt.s32.totalorder %s913_s23, %s607_s26  ;;  %p610_p1 = scmp.lt.s32.totalorder %s608_s15, %s602_s6 }
  0x5a   : > { %v279_v26 = vstv %s269_s5  ;;  %p605_p2 = pneg %p604_p0 }
  0x5b   : > { %v242_v21 = vsub.s32 %v229_v11, %v241_v19  ;;  %v252_v22 = vmul.u32 3, %v251_v20  ;;  %v284_v27 = vstv %s271_s16  ;;  %p611_p7 = por %p610_p1, %p609_p6 }
  0x5d   : > { %vm256_vm1 = vcmp.ne.s32.totalorder %v242_v21, 0  ;;  %vm258_vm2 = vcmp.lt.s32.totalorder %v242_v21, 0  ;;  %v262_v23 = vadd.s32 3, %v242_v21  ;;  %v253_v24 = vsub.s32 %v230_v15, %v252_v22  ;;  %p612_p12 = pnand %p611_p7, %p605_p2 }
  0x5e   : > { %vm260_vm3 = vmand %vm258_vm2, %vm256_vm1 }
  0x5f   : > { %v264_v28 = vsel %vm260_vm3, %v262_v23, %v242_v21  ;;  %vm257_vm4 = vcmp.ne.s32.totalorder %v253_v24, 0  ;;  %vm259_vm5 = vcmp.lt.s32.totalorder %v253_v24, 0  ;;  %v263_v29 = vadd.s32 3, %v253_v24 }
  0x60   : > { %vm272_vm6 = vcmp.eq.s32.totalorder %v264_v28, 0  ;;  %vm277_vm7 = vcmp.eq.s32.totalorder %v264_v28, 1  ;;  %vm282_vm8 = vcmp.eq.s32.totalorder %v264_v28, 2  ;;  %vm261_vm9 = vmand %vm259_vm5, %vm257_vm4 }
  0x61   : > { %v275_v30 = vsel %vm272_vm6, %v274_v25, 0.0  ;;  %v265_v31 = vsel %vm261_vm9, %v263_v29, %v253_v24  ;;  %v290_v32 = vsel %vm272_vm6, %v279_v26, 0.0  ;;  %v299_v33 = vsel %vm272_vm6, %v284_v27, 0.0 }
  0x62   : > { %v280_v34 = vsel %vm277_vm7, %v279_v26, %v275_v30  ;;  %vm273_vm10 = vcmp.eq.s32.totalorder %v265_v31, 0  ;;  %vm278_vm11 = vcmp.eq.s32.totalorder %v265_v31, 1  ;;  %vm283_vm12 = vcmp.eq.s32.totalorder %v265_v31, 2 }
  0x63   : > { %v285_v35 = vsel %vm282_vm8, %v284_v27, %v280_v34  ;;  %v276_v36 = vsel %vm273_vm10, %v274_v25, 0.0  ;;  %v292_v37 = vsel %vm277_vm7, %v284_v27, %v290_v32  ;;  %v291_v38 = vsel %vm273_vm10, %v279_v26, 0.0 }
  0x64   : > { %288 = vst.msk [vmem:[#allocation2] sm:$0xff] %vm287_vm0, %v285_v35  ;;  %v281_v39 = vsel %vm278_vm11, %v279_v26, %v276_v36  ;;  %v294_v40 = vsel %vm282_vm8, %v274_v25, %v292_v37  ;;  %v293_v41 = vsel %vm278_vm11, %v284_v27, %v291_v38  ;;  %v301_v42 = vsel %vm277_vm7, %v274_v25, %v299_v33 }
  0x65   : > { %v286_v43 = vsel %vm283_vm12, %v284_v27, %v281_v39  ;;  %297 = vst.msk [vmem:[#allocation2 + $0x10] sm:$0xff] %vm287_vm0, %v294_v40  ;;  %v295_v44 = vsel %vm283_vm12, %v274_v25, %v293_v41  ;;  %v303_v45 = vsel %vm282_vm8, %v279_v26, %v301_v42  ;;  %v300_v46 = vsel %vm273_vm10, %v284_v27, 0.0 }
  0x66   : > { %289 = vst.msk [vmem:[#allocation2 + $0x8] sm:$0xff] %vm287_vm0, %v286_v43  ;;  %298 = vst.msk [vmem:[#allocation2 + $0x18] sm:$0xff] %vm287_vm0, %v295_v44  ;;  %v302_v47 = vsel %vm278_vm11, %v274_v25, %v300_v46 }
  0x67   : > { %306 = vst.msk [vmem:[#allocation2 + $0x20] sm:$0xff] %vm287_vm0, %v303_v45  ;;  %v304_v48 = vsel %vm283_vm12, %v279_v26, %v302_v47 }
  0x68   : > { %307 = vst.msk [vmem:[#allocation2 + $0x28] sm:$0xff] %vm287_vm0, %v304_v48 }
  0x6b   : > { %v326_v49 = vld [vmem:[#allocation2] sm:$0xff] }
  0x6c   : > { %332 = vst.msk [vmem:[%s860_s19] sm:$0xff] %vm287_vm0, %v326_v49  ;;  %v328_v50 = vld [vmem:[#allocation2 + $0x10] sm:$0xff] }
  0x6d   : > { %v327_v51 = vld [vmem:[#allocation2 + $0x8] sm:$0xff]  ;;  %334 = vst.msk [vmem:[%s860_s19 + $0x10] sm:$0xff] %vm287_vm0, %v328_v50  ;;  %v329_v52 = vld [vmem:[#allocation2 + $0x18] sm:$0xff] }
  0x6e   : > { %v330_v53 = vld [vmem:[#allocation2 + $0x20] sm:$0xff]  ;;  %333 = vst.msk [vmem:[%s860_s19 + $0x8] sm:$0xff] %vm287_vm0, %v327_v51  ;;  %335 = vst.msk [vmem:[%s860_s19 + $0x18] sm:$0xff] %vm287_vm0, %v329_v52 }
  0x6f   : > { %336 = vst.msk [vmem:[%s860_s19 + $0x20] sm:$0xff] %vm287_vm0, %v330_v53  ;;  %v331_v54 = vld [vmem:[#allocation2 + $0x28] sm:$0xff] }
  0x70   : > { %337 = vst.msk [vmem:[%s860_s19 + $0x28] sm:$0xff] %vm287_vm0, %v331_v54 }
  0x71   : > { %615 = shalt.err (!%p612_p12)
}
  0x72   : > { %s616_s18 = scalar_lea.hbm %s924_s28, 1792  ;;  %s620_s24 = scalar_lea.hbm %s977_s2, 3584 }
  0x73   : > { %p617_p4 = scmp.ne.s32.totalorder %s924_s28, %s616_s18  ;;  %p621_p5 = scmp.lt.u32.totalorder %s924_s28, %s977_s2 }
  0x74   : > { %p622_p9 = scmp.lt.u32.totalorder %s620_s24, %s616_s18  ;;  %p624_p8 = scmp.lt.u32.totalorder %s616_s18, %s924_s28 }
  0x75   : > { %p618_p10 = pnand %p617_p4, %p990_p13 }
  0x76   : > { %p623_p3 = por %p622_p9, %p621_p5 }
  0x77   : > { %p619_p11 = pneg %p618_p10 }
  0x78   : > { %p625_p0 = por %p624_p8, %p623_p3 }
  0x7a   : > { %p626_p2 = pnand %p625_p0, %p619_p11 }
  0x7c   : > { %629 = shalt.err (!%p626_p2)
}
  0x7d   : > { %s695_s5 = smov 128   ;;  %s696_s16 = smov 8  }
  0x7e   : > { %488 = dma.vmem_to_hbm [thread:$0]  (%p990_p13), %s913_s23, 1792, %s924_s28, %s339_s30, %s695_s5, %s695_s5, %s696_s16  }
  0x7f PF: > { %s369_s17 = sand.u32 1, %s668_s9   ;;  %p991_p6 = scmp.ne.s32.totalorder %s985_s21, 0 }
  0x80   : > { %p992_p1 = scmp.ge.s32.totalorder %s688_s14, 2  ;;  %s370_s12 = scalar_lea.sflag [#allocation5], %s369_s17 }
  0x82   : > { %p499_p7 = pnand %p992_p1, %p991_p6 }
  0x84   : > { %663 = dma.done.wait (!%p499_p7), %s370_s12, 1792  }
  0x85   : > { %665 = vsyncadd (!%p499_p7), %s370_s12, 4294965504  ;;  %s19_s14 = sadd.s32 1, %s688_s14   ;;  %s993_s9 = smov %s672_s10 }
  0x86   : > { %p16_p12 = scmp.ge.s32.totalorder %s19_s14, 4   ;;  %s994_s10 = smov %s676_s11 }
  0x87   : > { %s995_s11 = smov %s813_s4  ;;  %s996_s12 = smov %s684_s13 }
  0x88   : > { %s997_s13 = smov %s999_s25  ;;  %18 = sbr.rel (!%p16_p12) target bundleno = 7 (0x7), region = 85 }
  0x8f   :  { %375 = vsyncpa [#allocation4], 1 }
  0x90   :  { %377 = vsyncpa [#allocation4 + $0x1], 1 }
  0x91   :  { %378 = vsyncpa [#allocation5], 1 }
  0x92   :  { %380 = vsyncpa [#allocation5 + $0x1], 1 }
  0x93   :  { %381 = vsyncpa [#allocation6], 1 }
  0x94   :  { %383 = vsyncpa [#allocation6 + $0x1], 1 }

</bundles_post_ra>
